<compile_context>
chip_gen: v6e
topology: v6e:2x2x1
jax: 0.10.0
libtpu: 0.0.40
codegen_flags: <defaults>
</compile_context>

<pallas_src>
import functools

import jax
import jax.numpy as jnp
from jax.experimental import pallas as pl
from jax.experimental.pallas import tpu as pltpu


def _fused_bn_relu_conv_x2_kernel(x_ref, m_ref, s0_ref, t0_ref, w0_ref, b0_ref,
                                  s1_ref, t1_ref, w1_ref, b1_ref, o_ref,
                                  *, H, W):
    """(BN->ReLU->Conv3x3) x 2 for a block of B images, fully VMEM-resident.

    x_ref:  (B, Cin, H*W) f32   input activations, channel-major, flat spatial
    m_ref:  (9, H*W)      f32   0/1 validity mask per conv tap (boundaries)
    s*/t*:  (C, 1)        f32   folded BN scale / shift per stage
    w*_ref: (Cout, 9*C)   bf16  conv weights, column = (ky*3+kx)*C + ci
    b*_ref: (Cout, 1)     f32   conv bias
    o_ref:  (B, Cout, H*W) f32  lane-dense output block
    """
    B = x_ref.shape[0]
    HW = H * W
    offsets = [(dy, dx) for dy in (-1, 0, 1) for dx in (-1, 0, 1)]

    def conv3x3(y, w_ref, b_ref):
        # y: (C, HW) f32.  9 taps via lane rolls + boundary masks, stacked to
        # (9*C, HW), then a single flipped MXU GEMM -> (Cout, HW).
        chunks = []
        for k, (dy, dx) in enumerate(offsets):
            d = dy * W + dx
            t = y if d == 0 else pltpu.roll(y, (-d) % HW, axis=1)
            if (dy, dx) != (0, 0):
                t = t * m_ref[k:k + 1, :]          # zero out-of-image taps
            chunks.append(t)
        patches = jnp.concatenate(chunks, axis=0).astype(jnp.bfloat16)
        out = jnp.dot(w_ref[...], patches,
                      preferred_element_type=jnp.float32)   # (Cout, HW) f32
        return out + b_ref[...]

    for b in range(B):                              # static unroll, B is small
        x = x_ref[b].astype(jnp.float32)            # (Cin, HW)
        a0 = jnp.maximum(x * s0_ref[...] + t0_ref[...], 0.0)
        h0 = conv3x3(a0, w0_ref, b0_ref)            # (Cout, HW), stays in vregs
        a1 = jnp.maximum(h0 * s1_ref[...] + t1_ref[...], 0.0)
        h1 = conv3x3(a1, w1_ref, b1_ref)            # (Cout, HW)
        o_ref[b] = h1.astype(o_ref.dtype)           # lane-dense, unmasked store


def _make_tap_masks(H, W):
    """(9, H*W) f32 validity masks, tap order k = (dy+1)*3 + (dx+1)."""
    idx = jnp.arange(H * W, dtype=jnp.int32)
    row = idx // W
    col = idx % W
    masks = []
    for dy in (-1, 0, 1):
        for dx in (-1, 0, 1):
            ok = ((row + dy >= 0) & (row + dy < H) &
                  (col + dx >= 0) & (col + dx < W))
            masks.append(ok.astype(jnp.float32))
    return jnp.stack(masks, axis=0)


def _pick_batch_block(n, cap=8):
    """Images per grid step: amortize step overhead, keep grid >= 2 for v7x."""
    if n <= 2:
        return 1
    for b in range(min(cap, n // 2), 0, -1):
        if n % b == 0:
            return b
    return 1


def continus_paralle_conv(x_nchw, params, *, batch_block=None):
    """Forward pass matching ContinusParalleConv(pre_Batch_Norm=True)."""
    N, Cin, H, W = x_nchw.shape
    HW = H * W
    p0, p1 = params["stage0"], params["stage1"]
    Cout = p0["w"].shape[0]

    B_blk = batch_block or _pick_batch_block(N)
    assert N % B_blk == 0

    x = x_nchw.reshape(N, Cin, HW)          # free reshape, channels on sublanes
    masks = _make_tap_masks(H, W)

    kernel = functools.partial(_fused_bn_relu_conv_x2_kernel, H=H, W=W)

    out = pl.pallas_call(
        kernel,
        out_shape=jax.ShapeDtypeStruct((N, Cout, HW), jnp.float32),
        grid_spec=pltpu.PrefetchScalarGridSpec(
            num_scalar_prefetch=0,
            grid=(N // B_blk,),
            in_specs=[
                pl.BlockSpec((B_blk, Cin, HW), lambda n: (n, 0, 0)),
                pl.BlockSpec((9, HW), lambda n: (0, 0)),
                pl.BlockSpec((Cin, 1), lambda n: (0, 0)),
                pl.BlockSpec((Cin, 1), lambda n: (0, 0)),
                pl.BlockSpec((Cout, 9 * Cin), lambda n: (0, 0)),
                pl.BlockSpec((Cout, 1), lambda n: (0, 0)),
                pl.BlockSpec((Cout, 1), lambda n: (0, 0)),
                pl.BlockSpec((Cout, 1), lambda n: (0, 0)),
                pl.BlockSpec((Cout, 9 * Cout), lambda n: (0, 0)),
                pl.BlockSpec((Cout, 1), lambda n: (0, 0)),
            ],
            out_specs=pl.BlockSpec((B_blk, Cout, HW), lambda n: (n, 0, 0)),
        ),
        compiler_params=pltpu.CompilerParams(
            dimension_semantics=("parallel",),   # shard batch across TCs (v7x)
            vmem_limit_bytes=32 * 1024 * 1024,
        ),
    )(x, masks, p0["scale"], p0["shift"], p0["w"], p0["b"],
      p1["scale"], p1["shift"], p1["w"], p1["b"])

    # (N, Cout, H*W) is already channel-major -> just unfold the spatial axis.
    return out.reshape(N, Cout, H, W)


def make_params(key, in_channels, out_channels, eps=1e-5):
    """Deterministic synthetic parameters for the two BN+Conv stages."""
    ks = jax.random.split(key, 12)
    params = {}
    for stage, (cin, cout) in enumerate([(in_channels, out_channels),
                                         (out_channels, out_channels)]):
        k0, k1, k2, k3, k4, k5 = ks[stage * 6:(stage + 1) * 6]
        gamma = jax.random.uniform(k0, (cin,), jnp.float32, 0.5, 1.5)
        beta = 0.1 * jax.random.normal(k1, (cin,), jnp.float32)
        mean = 0.1 * jax.random.normal(k2, (cin,), jnp.float32)
        var = jax.random.uniform(k3, (cin,), jnp.float32, 0.5, 1.5)
        # PyTorch conv weight (Cout, Cin, 3, 3) -> (Cout, 3, 3, Cin)
        #                     -> (Cout, 9*Cin) with column = (ky*3+kx)*Cin + ci
        w_torch = 0.1 * jax.random.normal(k4, (cout, cin, 3, 3), jnp.float32)
        w_mat = jnp.transpose(w_torch, (0, 2, 3, 1)).reshape(cout, 9 * cin)
        bias = 0.1 * jax.random.normal(k5, (cout,), jnp.float32)

        scale = gamma / jnp.sqrt(var + eps)
        shift = beta - mean * scale
        params[f"stage{stage}"] = dict(
            scale=scale.reshape(cin, 1),
            shift=shift.reshape(cin, 1),
            w=w_mat.astype(jnp.bfloat16),   # bf16 MXU operands (f32 accumulate)
            w_torch=w_torch,
            b=bias.reshape(cout, 1),
        )
    return params


def _reference(x, params):
    """Pure-JAX f32 reference (lax conv, NCHW/OIHW) for verification."""
    for stage in ("stage0", "stage1"):
        p = params[stage]
        c = p["scale"].shape[0]
        y = jnp.maximum(x * p["scale"].reshape(1, c, 1, 1)
                        + p["shift"].reshape(1, c, 1, 1), 0.0)
        x = jax.lax.conv_general_dilated(
            y, p["w_torch"], window_strides=(1, 1), padding="SAME",
            dimension_numbers=("NCHW", "OIHW", "NCHW"),
        ) + p["b"].reshape(1, -1, 1, 1)
    return x


if __name__ == "__main__":
    key = jax.random.PRNGKey(0)
    kx, kp = jax.random.split(key)

    N, Cin, Cout, H, W = 2, 4, 8, 16, 16
    x = jax.random.normal(kx, (N, Cin, H, W), jnp.float32)
    params = make_params(kp, Cin, Cout)

    out = jax.block_until_ready(continus_paralle_conv(x, params))
    ref = jax.block_until_ready(_reference(x, params))

    assert out.shape == (N, Cout, H, W), out.shape
    assert ref.shape == (N, Cout, H, W), ref.shape
    # Tolerance covers bf16 MXU operands (f32 accumulate) vs. the f32 XLA conv.
    assert jnp.allclose(out, ref, atol=2e-2, rtol=2e-2), float(
        jnp.max(jnp.abs(out - ref)))

    print("KERNEL_OK")
</pallas_src>

<mosaic_0001>
module attributes {stable_mosaic.version = 11 : i64} {
  func.func @_fused_bn_relu_conv_x2_kernel(%arg0: i32, %arg1: memref<1x4x256xf32, #tpu.memory_space<vmem>>, %arg2: memref<9x256xf32, #tpu.memory_space<vmem>>, %arg3: memref<4x1xf32, #tpu.memory_space<vmem>>, %arg4: memref<4x1xf32, #tpu.memory_space<vmem>>, %arg5: memref<8x36xbf16, #tpu.memory_space<vmem>>, %arg6: memref<8x1xf32, #tpu.memory_space<vmem>>, %arg7: memref<8x1xf32, #tpu.memory_space<vmem>>, %arg8: memref<8x1xf32, #tpu.memory_space<vmem>>, %arg9: memref<8x72xbf16, #tpu.memory_space<vmem>>, %arg10: memref<8x1xf32, #tpu.memory_space<vmem>>, %arg11: memref<1x8x256xf32, #tpu.memory_space<vmem>>) attributes {dimension_semantics = [#tpu.dimension_semantics<parallel>], iteration_bounds = array<i64: 2>, scalar_prefetch = 0 : i64, scratch_operands = 0 : i64, tpu.core_type = #tpu.core_type<tc>, window_params = [{transform_indices = @transform_0, window_bounds = array<i64: 1, 4, 256>}, {pipeline_mode = #tpu.pipeline_mode<synchronous>, transform_indices = @transform_1, window_bounds = array<i64: 9, 256>}, {pipeline_mode = #tpu.pipeline_mode<synchronous>, transform_indices = @transform_2, window_bounds = array<i64: 4, 1>}, {pipeline_mode = #tpu.pipeline_mode<synchronous>, transform_indices = @transform_3, window_bounds = array<i64: 4, 1>}, {pipeline_mode = #tpu.pipeline_mode<synchronous>, transform_indices = @transform_4, window_bounds = array<i64: 8, 36>}, {pipeline_mode = #tpu.pipeline_mode<synchronous>, transform_indices = @transform_5, window_bounds = array<i64: 8, 1>}, {pipeline_mode = #tpu.pipeline_mode<synchronous>, transform_indices = @transform_6, window_bounds = array<i64: 8, 1>}, {pipeline_mode = #tpu.pipeline_mode<synchronous>, transform_indices = @transform_7, window_bounds = array<i64: 8, 1>}, {pipeline_mode = #tpu.pipeline_mode<synchronous>, transform_indices = @transform_8, window_bounds = array<i64: 8, 72>}, {pipeline_mode = #tpu.pipeline_mode<synchronous>, transform_indices = @transform_9, window_bounds = array<i64: 8, 1>}, {transform_indices = @transform_10, window_bounds = array<i64: 1, 8, 256>}]} {
    %c0 = arith.constant 0 : index
    %c0_0 = arith.constant 0 : index
    %c0_1 = arith.constant 0 : index
    %0 = vector.load %arg1[%c0, %c0_0, %c0_1] : memref<1x4x256xf32, #tpu.memory_space<vmem>>, vector<1x4x256xf32>
    %1 = vector.shape_cast %0 : vector<1x4x256xf32> to vector<4x256xf32>
    %c0_2 = arith.constant 0 : index
    %c0_3 = arith.constant 0 : index
    %2 = vector.load %arg3[%c0_2, %c0_3] : memref<4x1xf32, #tpu.memory_space<vmem>>, vector<4x1xf32>
    %3 = vector.broadcast %2 : vector<4x1xf32> to vector<4x256xf32>
    %4 = arith.mulf %1, %3 : vector<4x256xf32>
    %c0_4 = arith.constant 0 : index
    %c0_5 = arith.constant 0 : index
    %5 = vector.load %arg4[%c0_4, %c0_5] : memref<4x1xf32, #tpu.memory_space<vmem>>, vector<4x1xf32>
    %6 = vector.broadcast %5 : vector<4x1xf32> to vector<4x256xf32>
    %7 = arith.addf %4, %6 : vector<4x256xf32>
    %cst = arith.constant 0.000000e+00 : f32
    %8 = vector.broadcast %cst : f32 to vector<4x256xf32>
    %9 = arith.maximumf %7, %8 : vector<4x256xf32>
    %c17_i32 = arith.constant 17 : i32
    %10 = tpu.dynamic_rotate %9 by %c17_i32 dim 1 : vector<4x256xf32>, i32 -> vector<4x256xf32>
    %c0_6 = arith.constant 0 : index
    %c0_7 = arith.constant 0 : index
    %11 = vector.load %arg2[%c0_6, %c0_7] : memref<9x256xf32, #tpu.memory_space<vmem>>, vector<1x256xf32>
    %12 = vector.broadcast %11 : vector<1x256xf32> to vector<4x256xf32>
    %13 = arith.mulf %10, %12 : vector<4x256xf32>
    %c16_i32 = arith.constant 16 : i32
    %14 = tpu.dynamic_rotate %9 by %c16_i32 dim 1 : vector<4x256xf32>, i32 -> vector<4x256xf32>
    %c1 = arith.constant 1 : index
    %c0_8 = arith.constant 0 : index
    %15 = vector.load %arg2[%c1, %c0_8] : memref<9x256xf32, #tpu.memory_space<vmem>>, vector<1x256xf32>
    %16 = vector.broadcast %15 : vector<1x256xf32> to vector<4x256xf32>
    %17 = arith.mulf %14, %16 : vector<4x256xf32>
    %c15_i32 = arith.constant 15 : i32
    %18 = tpu.dynamic_rotate %9 by %c15_i32 dim 1 : vector<4x256xf32>, i32 -> vector<4x256xf32>
    %c2 = arith.constant 2 : index
    %c0_9 = arith.constant 0 : index
    %19 = vector.load %arg2[%c2, %c0_9] : memref<9x256xf32, #tpu.memory_space<vmem>>, vector<1x256xf32>
    %20 = vector.broadcast %19 : vector<1x256xf32> to vector<4x256xf32>
    %21 = arith.mulf %18, %20 : vector<4x256xf32>
    %c1_i32 = arith.constant 1 : i32
    %22 = tpu.dynamic_rotate %9 by %c1_i32 dim 1 : vector<4x256xf32>, i32 -> vector<4x256xf32>
    %c3 = arith.constant 3 : index
    %c0_10 = arith.constant 0 : index
    %23 = vector.load %arg2[%c3, %c0_10] : memref<9x256xf32, #tpu.memory_space<vmem>>, vector<1x256xf32>
    %24 = vector.broadcast %23 : vector<1x256xf32> to vector<4x256xf32>
    %25 = arith.mulf %22, %24 : vector<4x256xf32>
    %c255_i32 = arith.constant 255 : i32
    %26 = tpu.dynamic_rotate %9 by %c255_i32 dim 1 : vector<4x256xf32>, i32 -> vector<4x256xf32>
    %c5 = arith.constant 5 : index
    %c0_11 = arith.constant 0 : index
    %27 = vector.load %arg2[%c5, %c0_11] : memref<9x256xf32, #tpu.memory_space<vmem>>, vector<1x256xf32>
    %28 = vector.broadcast %27 : vector<1x256xf32> to vector<4x256xf32>
    %29 = arith.mulf %26, %28 : vector<4x256xf32>
    %c241_i32 = arith.constant 241 : i32
    %30 = tpu.dynamic_rotate %9 by %c241_i32 dim 1 : vector<4x256xf32>, i32 -> vector<4x256xf32>
    %c6 = arith.constant 6 : index
    %c0_12 = arith.constant 0 : index
    %31 = vector.load %arg2[%c6, %c0_12] : memref<9x256xf32, #tpu.memory_space<vmem>>, vector<1x256xf32>
    %32 = vector.broadcast %31 : vector<1x256xf32> to vector<4x256xf32>
    %33 = arith.mulf %30, %32 : vector<4x256xf32>
    %c240_i32 = arith.constant 240 : i32
    %34 = tpu.dynamic_rotate %9 by %c240_i32 dim 1 : vector<4x256xf32>, i32 -> vector<4x256xf32>
    %c7 = arith.constant 7 : index
    %c0_13 = arith.constant 0 : index
    %35 = vector.load %arg2[%c7, %c0_13] : memref<9x256xf32, #tpu.memory_space<vmem>>, vector<1x256xf32>
    %36 = vector.broadcast %35 : vector<1x256xf32> to vector<4x256xf32>
    %37 = arith.mulf %34, %36 : vector<4x256xf32>
    %c239_i32 = arith.constant 239 : i32
    %38 = tpu.dynamic_rotate %9 by %c239_i32 dim 1 : vector<4x256xf32>, i32 -> vector<4x256xf32>
    %c8 = arith.constant 8 : index
    %c0_14 = arith.constant 0 : index
    %39 = vector.load %arg2[%c8, %c0_14] : memref<9x256xf32, #tpu.memory_space<vmem>>, vector<1x256xf32>
    %40 = vector.broadcast %39 : vector<1x256xf32> to vector<4x256xf32>
    %41 = arith.mulf %38, %40 : vector<4x256xf32>
    %42 = tpu.concatenate %13, %17, %21, %25, %9, %29, %33, %37, %41 in 0 : vector<4x256xf32>, vector<4x256xf32>, vector<4x256xf32>, vector<4x256xf32>, vector<4x256xf32>, vector<4x256xf32>, vector<4x256xf32>, vector<4x256xf32>, vector<4x256xf32> -> vector<36x256xf32>
    %43 = arith.truncf %42 : vector<36x256xf32> to vector<36x256xbf16>
    %c0_15 = arith.constant 0 : index
    %c0_16 = arith.constant 0 : index
    %44 = vector.load %arg5[%c0_15, %c0_16] : memref<8x36xbf16, #tpu.memory_space<vmem>>, vector<8x36xbf16>
    %cst_17 = arith.constant dense<0.000000e+00> : vector<8x256xf32>
    %45 = tpu.matmul %44, %43, %cst_17 {dimension_numbers = #tpu.dot_dimension_numbers<[1], [0], [0], [1], [0, 0, 1, 1], [], []>} : vector<8x36xbf16>, vector<36x256xbf16>, vector<8x256xf32> -> vector<8x256xf32>
    %c0_18 = arith.constant 0 : index
    %c0_19 = arith.constant 0 : index
    %46 = vector.load %arg6[%c0_18, %c0_19] : memref<8x1xf32, #tpu.memory_space<vmem>>, vector<8x1xf32>
    %47 = vector.broadcast %46 : vector<8x1xf32> to vector<8x256xf32>
    %48 = arith.addf %45, %47 : vector<8x256xf32>
    %c0_20 = arith.constant 0 : index
    %c0_21 = arith.constant 0 : index
    %49 = vector.load %arg7[%c0_20, %c0_21] : memref<8x1xf32, #tpu.memory_space<vmem>>, vector<8x1xf32>
    %50 = vector.broadcast %49 : vector<8x1xf32> to vector<8x256xf32>
    %51 = arith.mulf %48, %50 : vector<8x256xf32>
    %c0_22 = arith.constant 0 : index
    %c0_23 = arith.constant 0 : index
    %52 = vector.load %arg8[%c0_22, %c0_23] : memref<8x1xf32, #tpu.memory_space<vmem>>, vector<8x1xf32>
    %53 = vector.broadcast %52 : vector<8x1xf32> to vector<8x256xf32>
    %54 = arith.addf %51, %53 : vector<8x256xf32>
    %cst_24 = arith.constant 0.000000e+00 : f32
    %55 = vector.broadcast %cst_24 : f32 to vector<8x256xf32>
    %56 = arith.maximumf %54, %55 : vector<8x256xf32>
    %c17_i32_25 = arith.constant 17 : i32
    %57 = tpu.dynamic_rotate %56 by %c17_i32_25 dim 1 : vector<8x256xf32>, i32 -> vector<8x256xf32>
    %c0_26 = arith.constant 0 : index
    %c0_27 = arith.constant 0 : index
    %58 = vector.load %arg2[%c0_26, %c0_27] : memref<9x256xf32, #tpu.memory_space<vmem>>, vector<1x256xf32>
    %59 = vector.broadcast %58 : vector<1x256xf32> to vector<8x256xf32>
    %60 = arith.mulf %57, %59 : vector<8x256xf32>
    %c16_i32_28 = arith.constant 16 : i32
    %61 = tpu.dynamic_rotate %56 by %c16_i32_28 dim 1 : vector<8x256xf32>, i32 -> vector<8x256xf32>
    %c1_29 = arith.constant 1 : index
    %c0_30 = arith.constant 0 : index
    %62 = vector.load %arg2[%c1_29, %c0_30] : memref<9x256xf32, #tpu.memory_space<vmem>>, vector<1x256xf32>
    %63 = vector.broadcast %62 : vector<1x256xf32> to vector<8x256xf32>
    %64 = arith.mulf %61, %63 : vector<8x256xf32>
    %c15_i32_31 = arith.constant 15 : i32
    %65 = tpu.dynamic_rotate %56 by %c15_i32_31 dim 1 : vector<8x256xf32>, i32 -> vector<8x256xf32>
    %c2_32 = arith.constant 2 : index
    %c0_33 = arith.constant 0 : index
    %66 = vector.load %arg2[%c2_32, %c0_33] : memref<9x256xf32, #tpu.memory_space<vmem>>, vector<1x256xf32>
    %67 = vector.broadcast %66 : vector<1x256xf32> to vector<8x256xf32>
    %68 = arith.mulf %65, %67 : vector<8x256xf32>
    %c1_i32_34 = arith.constant 1 : i32
    %69 = tpu.dynamic_rotate %56 by %c1_i32_34 dim 1 : vector<8x256xf32>, i32 -> vector<8x256xf32>
    %c3_35 = arith.constant 3 : index
    %c0_36 = arith.constant 0 : index
    %70 = vector.load %arg2[%c3_35, %c0_36] : memref<9x256xf32, #tpu.memory_space<vmem>>, vector<1x256xf32>
    %71 = vector.broadcast %70 : vector<1x256xf32> to vector<8x256xf32>
    %72 = arith.mulf %69, %71 : vector<8x256xf32>
    %c255_i32_37 = arith.constant 255 : i32
    %73 = tpu.dynamic_rotate %56 by %c255_i32_37 dim 1 : vector<8x256xf32>, i32 -> vector<8x256xf32>
    %c5_38 = arith.constant 5 : index
    %c0_39 = arith.constant 0 : index
    %74 = vector.load %arg2[%c5_38, %c0_39] : memref<9x256xf32, #tpu.memory_space<vmem>>, vector<1x256xf32>
    %75 = vector.broadcast %74 : vector<1x256xf32> to vector<8x256xf32>
    %76 = arith.mulf %73, %75 : vector<8x256xf32>
    %c241_i32_40 = arith.constant 241 : i32
    %77 = tpu.dynamic_rotate %56 by %c241_i32_40 dim 1 : vector<8x256xf32>, i32 -> vector<8x256xf32>
    %c6_41 = arith.constant 6 : index
    %c0_42 = arith.constant 0 : index
    %78 = vector.load %arg2[%c6_41, %c0_42] : memref<9x256xf32, #tpu.memory_space<vmem>>, vector<1x256xf32>
    %79 = vector.broadcast %78 : vector<1x256xf32> to vector<8x256xf32>
    %80 = arith.mulf %77, %79 : vector<8x256xf32>
    %c240_i32_43 = arith.constant 240 : i32
    %81 = tpu.dynamic_rotate %56 by %c240_i32_43 dim 1 : vector<8x256xf32>, i32 -> vector<8x256xf32>
    %c7_44 = arith.constant 7 : index
    %c0_45 = arith.constant 0 : index
    %82 = vector.load %arg2[%c7_44, %c0_45] : memref<9x256xf32, #tpu.memory_space<vmem>>, vector<1x256xf32>
    %83 = vector.broadcast %82 : vector<1x256xf32> to vector<8x256xf32>
    %84 = arith.mulf %81, %83 : vector<8x256xf32>
    %c239_i32_46 = arith.constant 239 : i32
    %85 = tpu.dynamic_rotate %56 by %c239_i32_46 dim 1 : vector<8x256xf32>, i32 -> vector<8x256xf32>
    %c8_47 = arith.constant 8 : index
    %c0_48 = arith.constant 0 : index
    %86 = vector.load %arg2[%c8_47, %c0_48] : memref<9x256xf32, #tpu.memory_space<vmem>>, vector<1x256xf32>
    %87 = vector.broadcast %86 : vector<1x256xf32> to vector<8x256xf32>
    %88 = arith.mulf %85, %87 : vector<8x256xf32>
    %89 = tpu.concatenate %60, %64, %68, %72, %56, %76, %80, %84, %88 in 0 : vector<8x256xf32>, vector<8x256xf32>, vector<8x256xf32>, vector<8x256xf32>, vector<8x256xf32>, vector<8x256xf32>, vector<8x256xf32>, vector<8x256xf32>, vector<8x256xf32> -> vector<72x256xf32>
    %90 = arith.truncf %89 : vector<72x256xf32> to vector<72x256xbf16>
    %c0_49 = arith.constant 0 : index
    %c0_50 = arith.constant 0 : index
    %91 = vector.load %arg9[%c0_49, %c0_50] : memref<8x72xbf16, #tpu.memory_space<vmem>>, vector<8x72xbf16>
    %cst_51 = arith.constant dense<0.000000e+00> : vector<8x256xf32>
    %92 = tpu.matmul %91, %90, %cst_51 {dimension_numbers = #tpu.dot_dimension_numbers<[1], [0], [0], [1], [0, 0, 1, 1], [], []>} : vector<8x72xbf16>, vector<72x256xbf16>, vector<8x256xf32> -> vector<8x256xf32>
    %c0_52 = arith.constant 0 : index
    %c0_53 = arith.constant 0 : index
    %93 = vector.load %arg10[%c0_52, %c0_53] : memref<8x1xf32, #tpu.memory_space<vmem>>, vector<8x1xf32>
    %94 = vector.broadcast %93 : vector<8x1xf32> to vector<8x256xf32>
    %95 = arith.addf %92, %94 : vector<8x256xf32>
    %c0_54 = arith.constant 0 : index
    %c0_55 = arith.constant 0 : index
    %c0_56 = arith.constant 0 : index
    %96 = vector.load %arg11[%c0_54, %c0_55, %c0_56] : memref<1x8x256xf32, #tpu.memory_space<vmem>>, vector<1x8x256xf32>
    %97 = vector.shape_cast %96 : vector<1x8x256xf32> to vector<8x256xf32>
    %98 = vector.shape_cast %95 : vector<8x256xf32> to vector<1x8x256xf32>
    tpu.vector_store %arg11[%c0_54, %c0_55, %c0_56], %98 {strides = array<i32>} : memref<1x8x256xf32, #tpu.memory_space<vmem>>, vector<1x8x256xf32>,
    return
  }
  func.func @transform_0(%arg0: i32) -> (i32, i32, i32) {
    %c0_i32 = arith.constant 0 : i32
    %c0_i32_0 = arith.constant 0 : i32
    %c0_i32_1 = arith.constant 0 : i32
    return %arg0, %c0_i32, %c0_i32_0 : i32, i32, i32
  }
  func.func @transform_1(%arg0: i32) -> (i32, i32) {
    %c0_i32 = arith.constant 0 : i32
    %c0_i32_0 = arith.constant 0 : i32
    %c0_i32_1 = arith.constant 0 : i32
    return %c0_i32, %c0_i32_0 : i32, i32
  }
  func.func @transform_2(%arg0: i32) -> (i32, i32) {
    %c0_i32 = arith.constant 0 : i32
    %c0_i32_0 = arith.constant 0 : i32
    %c0_i32_1 = arith.constant 0 : i32
    return %c0_i32, %c0_i32_0 : i32, i32
  }
  func.func @transform_3(%arg0: i32) -> (i32, i32) {
    %c0_i32 = arith.constant 0 : i32
    %c0_i32_0 = arith.constant 0 : i32
    %c0_i32_1 = arith.constant 0 : i32
    return %c0_i32, %c0_i32_0 : i32, i32
  }
  func.func @transform_4(%arg0: i32) -> (i32, i32) {
    %c0_i32 = arith.constant 0 : i32
    %c0_i32_0 = arith.constant 0 : i32
    %c0_i32_1 = arith.constant 0 : i32
    return %c0_i32, %c0_i32_0 : i32, i32
  }
  func.func @transform_5(%arg0: i32) -> (i32, i32) {
    %c0_i32 = arith.constant 0 : i32
    %c0_i32_0 = arith.constant 0 : i32
    %c0_i32_1 = arith.constant 0 : i32
    return %c0_i32, %c0_i32_0 : i32, i32
  }
  func.func @transform_6(%arg0: i32) -> (i32, i32) {
    %c0_i32 = arith.constant 0 : i32
    %c0_i32_0 = arith.constant 0 : i32
    %c0_i32_1 = arith.constant 0 : i32
    return %c0_i32, %c0_i32_0 : i32, i32
  }
  func.func @transform_7(%arg0: i32) -> (i32, i32) {
    %c0_i32 = arith.constant 0 : i32
    %c0_i32_0 = arith.constant 0 : i32
    %c0_i32_1 = arith.constant 0 : i32
    return %c0_i32, %c0_i32_0 : i32, i32
  }
  func.func @transform_8(%arg0: i32) -> (i32, i32) {
    %c0_i32 = arith.constant 0 : i32
    %c0_i32_0 = arith.constant 0 : i32
    %c0_i32_1 = arith.constant 0 : i32
    return %c0_i32, %c0_i32_0 : i32, i32
  }
  func.func @transform_9(%arg0: i32) -> (i32, i32) {
    %c0_i32 = arith.constant 0 : i32
    %c0_i32_0 = arith.constant 0 : i32
    %c0_i32_1 = arith.constant 0 : i32
    return %c0_i32, %c0_i32_0 : i32, i32
  }
  func.func @transform_10(%arg0: i32) -> (i32, i32, i32) {
    %c0_i32 = arith.constant 0 : i32
    %c0_i32_0 = arith.constant 0 : i32
    %c0_i32_1 = arith.constant 0 : i32
    return %arg0, %c0_i32, %c0_i32_0 : i32, i32, i32
  }
}

</mosaic_0001>

<bundles_post_ra>
// kernel: tpu_custom_call.1
= control target key start
LH: loop header
LB: loop body
LE: loop exit
PB: predicated region body
PF: predicated region fallthrough
CT: control target
= control target key end

     0   :  { %15 = vsyncpa [#allocation3], 0  ;;  %s1594_s0 = inlined_call_operand.hbm [shape: f32[2,4,256], index: 0, kind: input, shape index: {}]   ;;  %s1595_s1 = inlined_call_operand.vmem [shape: f32[9,256], index: 1, kind: input, shape index: {}]   ;;  %s1596_s2 = inlined_call_operand.vmem [shape: f32[4,1], index: 2, kind: input, shape index: {}]   ;;  %s1597_s3 = inlined_call_operand.vmem [shape: f32[4,1], index: 3, kind: input, shape index: {}]   ;;  %s1598_s4 = inlined_call_operand.vmem [shape: bf16[8,36], index: 4, kind: input, shape index: {}]   ;;  %s1599_s5 = inlined_call_operand.vmem [shape: f32[8,1], index: 5, kind: input, shape index: {}]   ;;  %s1600_s6 = inlined_call_operand.vmem [shape: f32[8,1], index: 6, kind: input, shape index: {}]   ;;  %s1601_s7 = inlined_call_operand.vmem [shape: f32[8,1], index: 7, kind: input, shape index: {}]   ;;  %s1602_s8 = inlined_call_operand.vmem [shape: bf16[8,72], index: 8, kind: input, shape index: {}]   ;;  %s1603_s9 = inlined_call_operand.vmem [shape: f32[8,1], index: 9, kind: input, shape index: {}]   ;;  %s1604_s10 = inlined_call_operand.hbm [shape: f32[2,8,256], index: 10, kind: output, shape index: {}]  }
   0x1   :  { %17 = vsyncpa [#allocation3 + $0x1], 0 }
   0x2   :  { %18 = vsyncpa [#allocation4], 0 }
   0x3   :  { %20 = vsyncpa [#allocation4 + $0x1], 0  ;;  %s1168_s13 = smov 0   ;;  %s1170_s14 = smov 0  }
   0x4   :  { %s1172_s15 = smov 0   ;;  %s1174_s16 = smov 0  }
   0x5 LB: > { %1612 = sst [smem:[#allocation8_spill]] %s1095_s15  ;;  %s1189_s17 = sadd.s32 4294967295, %s1099_s16   ;;  %s1099_s16 = sphi %s1174_s16, %s1627_s16   ;;  %s1095_s15 = sphi %s1172_s15, %s1629_s15   ;;  %s1091_s14 = sphi %s1170_s14, %s1631_s14   ;;  %s1087_s13 = sphi %s1168_s13, %s1630_s13  }
   0x6   : > { %s922_s18 = sadd.s32 4294967294, %s1099_s16   ;;  %s1193_s19 = sadd.s32 1, %s1099_s16  }
   0x7   : > { %1613 = sst [smem:[#allocation9_spill]] %s1193_s19  ;;  %s33_s20 = sadd.s32 1, %s1095_s15 }
   0x8   : > { %s30_s21 = ssub.s32 %s1099_s16, %s1193_s19  ;;  %p40_p0 = scmp.ne.s32.totalorder %s1095_s15, %s1091_s14 }
   0x9   : > { %p31_p1 = scmp.eq.s32.totalorder %s30_s21, 0  ;;  %p41_p2 = scmp.eq.s32.totalorder %s1099_s16, 0 }
   0xa   : > { %p46_p3 = scmp.ne.s32.totalorder %s1091_s14, %s1087_s13  ;;  %p47_p4 = scmp.eq.s32.totalorder %s1189_s17, 0 }
   0xb   : > { %s1205_s22 = scalar_select %p31_p1, %s1095_s15, %s33_s20  }
   0xc   : > { %p1207_p5 = por %p41_p2, %p40_p0  ;;  %p1211_p6 = por %p47_p4, %p46_p3 }
   0xd   : > { %1614 = sst [smem:[#allocation10_spill]] %s1205_s22  ;;  %p259_p7 = scmp.eq.s32.totalorder %s1189_s17, 1 }
   0xe   : > { %s1616_s24 = scalar_select %p1211_p6, 1, 0 }
   0xf   : > { %p265_p8 = scmp.eq.s32.totalorder %s922_s18, 1  ;;  %p961_p10 = scmp.lt.s32.totalorder %s1099_s16, 2 }
  0x10   : > { %p1218_p11 = por %p259_p7, %p40_p0  ;;  %s312_s27 = sand.u32 1, %s1095_s15  }
  0x11   : > { %p1222_p12 = por %p265_p8, %p46_p3  ;;  %s947_s28 = sshll.u32 %s1099_s16, 7 }
  0x12   : > { %s1617_s25 = scalar_select %p1218_p11, 1, 0 }
  0x13   : > { %s1618_s26 = scalar_select %p1222_p12, 1, 0 }
  0x14   : > { %s925_s29 = sshll.u32 %s312_s27, 3  ;;  %s1231_s12 = scalar_lea.hbm %s1594_s0, %s947_s28 }
  0x15   : > { %s316_s18 = scalar_lea.vmem [#allocation2], %s925_s29  ;;  %p1235_p13 = pnand %p961_p10, %p1207_p5 }
  0x16   : > { %s324_s20 = sshll.u32 %s316_s18, 4  ;;  %s313_s22 = scalar_lea.sflag [#allocation3], %s312_s27  ;;  %s1239_s20 = int_to_ptr.vmem [resolvable:$true] %s324_s20 }
  0x17   : > { %s1007_s15 = scalar_lea.hbm %s1231_s12, 128  ;;  %p1009_p3 = pneg %p1235_p13 }
  0x18   : > { %p1008_p2 = scmp.ne.s32.totalorder %s1231_s12, %s1007_s15  ;;  %s1012_s23 = scalar_lea.hbm %s1594_s0, 256 }
  0x19   : > { %p1013_p5 = scmp.lt.s32.totalorder %s1231_s12, %s1594_s0  ;;  %p1014_p8 = scmp.lt.s32.totalorder %s1012_s23, %s1007_s15 }
  0x1a   : > { %p1010_p4 = pnand %p1009_p3, %p1008_p2 }
  0x1b   : > { %p1015_p10 = por %p1014_p8, %p1013_p5 }
  0x1c   : > { %p1011_p7 = pneg %p1010_p4 }
  0x1e   : > { %p1016_p9 = pnand %p1015_p10, %p1011_p7 }
  0x20   : > { %1019 = shalt.err (!%p1016_p9)
}
  0x21   : > { %s1020_s27 = scalar_lea.vmem %s1239_s20, 128  ;;  %s1101_s18 = smov [#allocation2]  }
  0x22   : > { %p1021_p0 = scmp.ne.s32.totalorder %s1239_s20, %s1020_s27  ;;  %s1025_s19 = sshll.u32 %s1101_s18, 4  ;;  %s1026_s19 = int_to_ptr.vmem [resolvable:$false] %s1025_s19 }
  0x23   : > { %s1027_s28 = scalar_lea.vmem %s1026_s19, 256  ;;  %p1028_p4 = scmp.lt.s32.totalorder %s1239_s20, %s1026_s19 }
  0x24   : > { %p1023_p1 = pnand %p1021_p0, %p1009_p3  ;;  %p1029_p12 = scmp.lt.s32.totalorder %s1027_s28, %s1020_s27 }
  0x26   : > { %p1024_p2 = pneg %p1023_p1  ;;  %p1030_p11 = por %p1029_p12, %p1028_p4 }
  0x28   : > { %p1031_p6 = pnand %p1030_p11, %p1024_p2 }
  0x2a   : > { %1034 = shalt.err (!%p1031_p6)
}
  0x2b   : > { %956 = dma.hbm_to_vmem [thread:$0]  (!%p1235_p13), %s1231_s12, 128, %s1239_s20, %s313_s22  }
  0x2c   : > { %p1620_p9 = scmp.lt.s32.totalorder %s1099_s16, 3  ;;  %p1621_p7 = scmp.ge.s32.totalorder %s1099_s16, 1 }
  0x2e   : > { %p330_p0 = pnand %p1621_p7, %p1620_p9 }
  0x2f   : > { %s1266_s15 = sand.u32 (!%p330_p0), 1, %s1091_s14   ;;  %p1622_p6 = scmp.ne.s32.totalorder (!%p330_p0), %s1616_s24, 0 }
  0x30   : > { %333 = sbr.rel (%p330_p0) target bundleno = 914 (0x392), region = 60  ;;  %s929_s19 = sshll.u32 (!%p330_p0), %s1266_s15, 3 }
  0x31   : > { %s336_s29 = scalar_lea.sflag (!%p330_p0), [#allocation3], %s1266_s15  ;;  %s339_s23 = scalar_lea.vmem (!%p330_p0), [#allocation2], %s929_s19 }
  0x35   : > { %1078 = dma.done.wait (%p1622_p6), %s336_s29, 128  }
  0x36   : > { %1080 = vsyncadd (%p1622_p6), %s336_s29, 4294967168  ;;  %v1102_v0 = vmov 0   ;;  %v378_v1 = vld [vmem:[%s1596_s2] sm:$0xf]  ;;  %v1103_v3 = vmov 839922192   ;;  %v386_v5 = vlaneseq }
  0x37   : > { %1005 = vset.pattern.permute.xlu0 %v1102_v0  ;;  %676 = vmatprep.mubr.bf16.mxu0 %v1102_v0  ;;  %v392_v2 = vld [vmem:[%s1597_s3] sm:$0xf]  ;;  %v384_v4 = vunpack.c.l.s4 %v1103_v3  ;;  %s1104_s24 = smov 127   ;;  %s1105_s30 = smov 111   ;;  %vm637_vm2 = vcmask 1041408   ;;  %vm611_vm5 = vcmask 1043456  }
  0x38   : > { %1006 = vset.pattern.permute.xlu1 %v1102_v0  ;;  %826 = vmatprep.mubr.bf16.mxu1 %v1102_v0  ;;  %v387_v7 = vshrl.u32 %v386_v5, 7  ;;  %v377_v11 = vld [vmem:[%s339_s23] sm:$0xff]  ;;  %s1106_s11 = smov 112   ;;  %s1107_s27 = smov 113   ;;  %v1327_v21 = vand.u32 127, %v386_v5  ;;  %vm633_vm10 = vcmask 293888  }
  0x39   : > { %381 = vperm.xlu0 %1005, %v378_v1   ;;  %v385_v6 = vunpack.c.0.s8 %v384_v4  ;;  %s1610_s18 = smov 16   ;;  %s1109_s28 = smov 1   ;;  %v627_v18 = vld [vmem:[%s1599_s5] sm:$0xff]  ;;  %v937_v24 = vld [vmem:[%s1595_s1 + $0x10] ss:$8 sm:$0x3] }
  0x3a   : > { %s1110_s19 = smov 17   ;;  %s1111_s29 = smov 15   ;;  %v693_v19 = vld [vmem:[%s1601_s7] sm:$0xff]  ;;  %v1329_v22 = vsub.s32 0, %v387_v7  ;;  %v1331_v23 = vsub.s32 1, %v387_v7  ;;  %vm569_vm0 = vcmp.lt.s32.totalorder %v1327_v21, 111 }
  0x3b   : > { %v388_v8 = vsub.s32 %v385_v6, %v387_v7  ;;  %v685_v20 = vld [vmem:[%s1600_s6] sm:$0xff]  ;;  %vm503_vm1 = vcmp.lt.s32.totalorder %v1327_v21, 127  ;;  %vm547_vm3 = vcmp.lt.s32.totalorder %v1327_v21, 112  ;;  %vm525_vm4 = vcmp.lt.s32.totalorder %v1327_v21, 113  ;;  %p1624_p12 = scmp.ne.s32.totalorder %s1617_s25, 0 }
  0x3c   : > { %v1338_v27 = vrot.slane %v937_v24, %v1329_v22  ;;  %v1341_v28 = vrot.slane %v937_v24, %v1331_v23  ;;  %v934_v33 = vld [vmem:[%s1595_s1 + $0x5] ss:$8 sm:$0x3]  ;;  %v936_v36 = vld [vmem:[%s1595_s1 + $0x7] ss:$8 sm:$0x3] }
  0x3d   : > { %395 = vperm.xlu0 %1005, %v392_v2   ;;  %v1357_v38 = vrot.slane %v934_v33, %v1329_v22  ;;  %v1360_v39 = vrot.slane %v934_v33, %v1331_v23  ;;  %v1368_v46 = vrot.slane %v936_v36, %v1329_v22  ;;  %v1371_v47 = vrot.slane %v936_v36, %v1331_v23  ;;  %v935_v48 = vld [vmem:[%s1595_s1 + $0x6] ss:$8 sm:$0x3] }
  0x3e   : > { %v1386_v57 = vrot.slane %v935_v48, %v1329_v22  ;;  %v1389_v58 = vrot.slane %v935_v48, %v1331_v23  ;;  %vm437_vm6 = vcmp.lt.s32.totalorder %v1327_v21, 16  ;;  %vm481_vm7 = vcmp.lt.s32.totalorder %v1327_v21, 1 }
  0x3f   : > { %vm416_vm8 = vcmp.lt.s32.totalorder %v1327_v21, 17  ;;  %vm459_vm9 = vcmp.lt.s32.totalorder %v1327_v21, 15  ;;  %vm784_vm11 = vcmask 588800  }
  0xb4   : > { %v382_v9 = vpop.permute.xlu0 %381 }
  0xb5   : > { %v389_v10 = vrot.slane %v382_v9, %v388_v8 }
  0xb7   : > { %v391_v13 = vmul.f32 %v389_v10, %v377_v11 }
  0xb8   : > { %v396_v12 = vpop.permute.xlu0 %395 }
  0xb9   : > { %v403_v14 = vrot.slane %v396_v12, %v388_v8  ;;  %v931_v12 = vld [vmem:[%s1595_s1 + $0x1] ss:$8 sm:$0x3] }
  0xbb   : > { %v405_v15 = vadd.f32 %v403_v14, %v391_v13  ;;  %v933_v13 = vld [vmem:[%s1595_s1 + $0x3] ss:$8 sm:$0x3] }
  0xbd   : > { %v1280_v16 = vmax.f32 %v405_v15, 0.0  ;;  %v1412_v15 = vrot.slane %v931_v12, %v1329_v22 }
  0xbf   : > { %499 = vrot.lane.b32.xlu0 %v1280_v16, %s1104_s24  ;;  %565 = vrot.lane.b32.xlu1 %v1280_v16, %s1105_s30  ;;  %v1288_v17 = vcombine.high %v1280_v16, %v1280_v16 }
  0xc3   : > { %543 = vrot.lane.b32.xlu0 %v1280_v16, %s1106_s11  ;;  %567 = vrot.lane.b32.xlu1 %v1288_v17, %s1105_s30 }
  0xc7   : > { %521 = vrot.lane.b32.xlu0 %v1280_v16, %s1107_s27  ;;  %501 = vrot.lane.b32.xlu1 %v1288_v17, %s1104_s24 }
  0xcb   : > { %433 = vrot.lane.b32.xlu0 %v1280_v16, %s1610_s18  ;;  %545 = vrot.lane.b32.xlu1 %v1288_v17, %s1106_s11 }
  0xcf   : > { %477 = vrot.lane.b32.xlu0 %v1280_v16, %s1109_s28  ;;  %523 = vrot.lane.b32.xlu1 %v1288_v17, %s1107_s27 }
  0xd3   : > { %410 = vrot.lane.b32.xlu0 %v1280_v16, %s1110_s19  ;;  %435 = vrot.lane.b32.xlu1 %v1288_v17, %s1610_s18 }
  0xd7   : > { %455 = vrot.lane.b32.xlu0 %v1280_v16, %s1111_s29  ;;  %479 = vrot.lane.b32.xlu1 %v1288_v17, %s1109_s28 }
  0xdb   : > { %630 = vperm.xlu0 %1005, %v627_v18   ;;  %412 = vrot.lane.b32.xlu1 %v1288_v17, %s1110_s19  ;;  %v419_v18 = vld [vmem:[%s1595_s1] ss:$8 sm:$0x3] }
  0xdf   : > { %696 = vperm.xlu0 %1005, %v693_v19   ;;  %457 = vrot.lane.b32.xlu1 %v1288_v17, %s1111_s29 }
  0xe3   : > { %688 = vperm.xlu1 %1006, %v685_v20  }
 0x131   : > { %v500_v25 = vpop.permute.xlu0 %499  ;;  %v566_v26 = vpop.permute.xlu1 %565 }
 0x135   : > { %v544_v29 = vpop.permute.xlu0 %543  ;;  %v568_v30 = vpop.permute.xlu1 %567 }
 0x136   : > { %v570_v31 = vsel %vm569_vm0, %v566_v26, %v568_v30  ;;  %v571_v32 = vsel %vm569_vm0, %v568_v30, %v566_v26  ;;  %v932_v30 = vld [vmem:[%s1595_s1 + $0x2] ss:$8 sm:$0x3] }
 0x137   : > { %v585_v34 = vmul.f32 %v1338_v27, %v570_v31  ;;  %v586_v35 = vmul.f32 %v1341_v28, %v571_v32  ;;  %v1439_v31 = vrot.slane %v419_v18, %v1329_v22  ;;  %v1442_v32 = vrot.slane %v419_v18, %v1331_v23 }
 0x139   : > { %v522_v37 = vpop.permute.xlu0 %521  ;;  %v502_v40 = vpop.permute.xlu1 %501  ;;  %v625_v41 = vpack.c.bf16 %v586_v35, %v586_v35  ;;  %v624_v42 = vpack.c.bf16 %v585_v34, %v585_v34 }
 0x13a   : > { %v504_v43 = vsel %vm503_vm1, %v500_v25, %v502_v40  ;;  %v505_v44 = vsel %vm503_vm1, %v502_v40, %v500_v25  ;;  %v1428_v25 = vrot.slane %v933_v13, %v1331_v23 }
 0x13b   : > { %938 = vmatprep.subr.msk.bf16.mxu0 %vm637_vm2, %v625_v41  ;;  %v639_v45 = vsel %vm637_vm2, %v624_v42, 0  ;;  %v519_v49 = vmul.f32 %v1357_v38, %v504_v43  ;;  %v520_v50 = vmul.f32 %v1360_v39, %v505_v44  ;;  %v1454_v42 = vrot.slane %v932_v30, %v1329_v22 }
 0x13c   : > { %655 = vmatpush1.bf16.msra.mxu0 %v639_v45  ;;  %v1457_v43 = vrot.slane %v932_v30, %v1331_v23 }
 0x13d   : > { %v546_v51 = vpop.permute.xlu1 %545  ;;  %v434_v54 = vpop.permute.xlu0 %433  ;;  %v601_v59 = vrot.slane %v519_v49, 4  ;;  %v602_v60 = vrot.slane %v520_v50, 4 }
 0x13e   : > { %v548_v52 = vsel %vm547_vm3, %v544_v29, %v546_v51  ;;  %v549_v53 = vsel %vm547_vm3, %v546_v51, %v544_v29 }
 0x13f   : > { %v563_v55 = vmul.f32 %v1368_v46, %v548_v52  ;;  %v564_v56 = vmul.f32 %v1371_v47, %v549_v53  ;;  %v617_v6 = vsel %vm611_vm5, %v1288_v17, %v602_v60  ;;  %v616_v8 = vsel %vm611_vm5, %v1280_v16, %v601_v59 }
 0x140   : > { %v1415_v16 = vrot.slane %v931_v12, %v1331_v23  ;;  %v1418_v17 = vrot.slane %v933_v13, %v1329_v22 }
 0x141   : > { %v524_v61 = vpop.permute.xlu1 %523  ;;  %v607_v0 = vrot.slane %v563_v55, 4  ;;  %v608_v1 = vrot.slane %v564_v56, 4  ;;  %v478_v4 = vpop.permute.xlu0 %477 }
 0x142   : > { %v526_v62 = vsel %vm525_vm4, %v522_v37, %v524_v61  ;;  %v527_v63 = vsel %vm525_vm4, %v524_v61, %v522_v37 }
 0x143   : > { %v541_v2 = vmul.f32 %v1386_v57, %v526_v62  ;;  %v542_v3 = vmul.f32 %v1389_v58, %v527_v63 }
 0x145   : > { %v436_v5 = vpop.permute.xlu1 %435  ;;  %v619_v7 = vsel %vm611_vm5, %v542_v3, %v608_v1  ;;  %v618_v9 = vsel %vm611_vm5, %v541_v2, %v607_v0  ;;  %v411_v19 = vpop.permute.xlu0 %410  ;;  %v626_v0 = vld [vmem:[%s1598_s4] sm:$0xf] }
 0x146   : > { %v623_v10 = vpack.c.bf16 %v619_v7, %v617_v6  ;;  %v622_v11 = vpack.c.bf16 %v618_v9, %v616_v8  ;;  %v438_v20 = vsel %vm437_vm6, %v434_v54, %v436_v5  ;;  %v439_v24 = vsel %vm437_vm6, %v436_v5, %v434_v54 }
 0x147   : > { %v453_v34 = vmul.f32 %v1412_v15, %v439_v24  ;;  %v454_v35 = vmul.f32 %v1415_v16, %v438_v20 }
 0x148   : > { %656 = vmatprep.subr.bf16.mxu0 %v623_v10 }
 0x149   : > { %657 = vmatpush1.bf16.msra.mxu0 %v622_v11  ;;  %v480_v14 = vpop.permute.xlu1 %479  ;;  %v456_v44 = vpop.permute.xlu0 %455  ;;  %v589_v50 = vrot.slane %v453_v34, 4  ;;  %v590_v51 = vrot.slane %v454_v35, 4 }
 0x14a   : > { %v482_v26 = vsel %vm481_vm7, %v478_v4, %v480_v14  ;;  %v483_v29 = vsel %vm481_vm7, %v480_v14, %v478_v4 }
 0x14b   : > { %v497_v40 = vmul.f32 %v1418_v17, %v483_v29  ;;  %v498_v41 = vmul.f32 %v1428_v25, %v482_v26 }
 0x14d   : > { %v413_v33 = vpop.permute.xlu1 %412  ;;  %v595_v54 = vrot.slane %v497_v40, 4  ;;  %v596_v22 = vrot.slane %v498_v41, 4 }
 0x14e   : > { %v417_v36 = vsel %vm416_vm8, %v411_v19, %v413_v33  ;;  %v418_v37 = vsel %vm416_vm8, %v413_v33, %v411_v19  ;;  %v778_v19 = vld [vmem:[%s1603_s9] sm:$0xff] }
 0x14f   : > { %v431_v45 = vmul.f32 %v1439_v31, %v418_v37  ;;  %v432_v48 = vmul.f32 %v1442_v32, %v417_v36 }
 0x151   : > { %v458_v49 = vpop.permute.xlu1 %457  ;;  %v613_v56 = vsel %vm611_vm5, %v432_v48, %v590_v51  ;;  %v612_v60 = vsel %vm611_vm5, %v431_v45, %v589_v50 }
 0x152   : > { %v460_v52 = vsel %vm459_vm9, %v456_v44, %v458_v49  ;;  %v461_v53 = vsel %vm459_vm9, %v458_v49, %v456_v44 }
 0x153   : > { %v475_v55 = vmul.f32 %v1454_v42, %v461_v53  ;;  %v476_v23 = vmul.f32 %v1457_v43, %v460_v52 }
 0x155   : > { %v615_v59 = vsel %vm611_vm5, %v476_v23, %v596_v22  ;;  %v614_v61 = vsel %vm611_vm5, %v475_v55, %v595_v54 }
 0x156   : > { %v621_v62 = vpack.c.bf16 %v615_v59, %v613_v56  ;;  %v620_v63 = vpack.c.bf16 %v614_v61, %v612_v60  ;;  %v631_v1 = vpop.permute.xlu0 %630 }
 0x158   : > { %658 = vmatprep.subr.bf16.mxu0 %v621_v62 }
 0x159   : > { %659 = vmatpush1.bf16.msra.mxu0 %v620_v63 }
 0x15a   : > { %v697_v8 = vpop.permute.xlu0 %696 }
 0x15c   : > { %939 = vmatmul.mubr.msk.bf16.vlgmr.msra.gmra.mxu0 %vm633_vm10, %v626_v0 }
 0x15e   : > { %v689_v3 = vpop.permute.xlu1 %688 }
 0x21c   : > { %v678_v2 = vpop.f32.mrf.mxu0 }
 0x21d   : > { %v679_v4 = vadd.f32 %v678_v2, %v631_v1 }
 0x21e   : > { %v680_v5 = vpop.f32.mrf.mxu0 }
 0x21f   : > { %v681_v6 = vadd.f32 %v680_v5, %v631_v1  ;;  %v691_v7 = vmul.f32 %v689_v3, %v679_v4 }
 0x220   : > { %v682_v9 = vpop.f32.mrf.mxu0 }
 0x221   : > { %v692_v10 = vmul.f32 %v689_v3, %v681_v6  ;;  %v699_v11 = vadd.f32 %v697_v8, %v691_v7 }
 0x222   : > { %v683_v12 = vpop.f32.mrf.mxu0 }
 0x223   : > { %v700_v13 = vadd.f32 %v697_v8, %v692_v10  ;;  %v701_v14 = vmax.f32 %v699_v11, 0.0 }
 0x225   : > { %v702_v18 = vmax.f32 %v700_v13, 0.0  ;;  %759 = vrot.lane.b32.xlu1 %v701_v14, %s1105_s30 }
 0x227   : > { %761 = vrot.lane.b32.xlu0 %v702_v18, %s1105_s30  ;;  %s1623_s30 = smov 16  }
 0x229   : > { %743 = vrot.lane.b32.xlu1 %v701_v14, %s1107_s27 }
 0x22b   : > { %745 = vrot.lane.b32.xlu0 %v702_v18, %s1107_s27 }
 0x22d   : > { %751 = vrot.lane.b32.xlu1 %v701_v14, %s1106_s11 }
 0x22f   : > { %753 = vrot.lane.b32.xlu0 %v702_v18, %s1106_s11 }
 0x231   : > { %735 = vrot.lane.b32.xlu1 %v701_v14, %s1104_s24 }
 0x233   : > { %737 = vrot.lane.b32.xlu0 %v702_v18, %s1104_s24 }
 0x235   : > { %719 = vrot.lane.b32.xlu1 %v701_v14, %s1111_s29 }
 0x237   : > { %721 = vrot.lane.b32.xlu0 %v702_v18, %s1111_s29  ;;  %s948_s29 = sshll.u32 %s1189_s17, 8  ;;  %s838_s17 = scalar_lea.sflag [#allocation4], %s1266_s15 }
 0x238   : > { %s1551_s20 = scalar_lea.hbm %s1604_s10, %s948_s29 }
 0x239   : > { %727 = vrot.lane.b32.xlu1 %v701_v14, %s1109_s28 }
 0x23b   : > { %729 = vrot.lane.b32.xlu0 %v702_v18, %s1109_s28 }
 0x23d   : > { %703 = vrot.lane.b32.xlu1 %v701_v14, %s1110_s19 }
 0x23f   : > { %705 = vrot.lane.b32.xlu0 %v702_v18, %s1110_s19  ;;  %s930_s19 = sshll.u32 %s1266_s15, 4 }
 0x240   : > { %s375_s23 = scalar_lea.vmem [#allocation5], %s930_s19 }
 0x241   : > { %711 = vrot.lane.b32.xlu1 %v701_v14, %s1623_s30  ;;  %s852_s22 = sshll.u32 %s375_s23, 4  ;;  %s1553_s22 = int_to_ptr.vmem [resolvable:$true] %s852_s22 }
 0x242   : > { %s1035_s21 = scalar_lea.vmem %s1553_s22, 256 }
 0x243   : > { %713 = vrot.lane.b32.xlu0 %v702_v18, %s1623_s30  ;;  %p1036_p11 = scmp.ne.s32.totalorder %s1553_s22, %s1035_s21  ;;  %s1112_s30 = smov [#allocation5]  }
 0x244   : > { %s1039_s27 = sshll.u32 %s1112_s30, 4  ;;  %s1040_s27 = int_to_ptr.vmem [resolvable:$false] %s1039_s27 }
 0x245   : > { %781 = vperm.xlu1 %1006, %v778_v19   ;;  %p1037_p13 = pnand %p1036_p11, %p1624_p12  ;;  %s1041_s11 = scalar_lea.vmem %s1040_s27, 512 }
 0x246   : > { %p1042_p3 = scmp.lt.s32.totalorder %s1553_s22, %s1040_s27  ;;  %p1043_p5 = scmp.lt.s32.totalorder %s1041_s11, %s1035_s21 }
 0x247   : > { %p1038_p1 = pneg %p1037_p13 }
 0x248   : > { %p1044_p8 = por %p1043_p5, %p1042_p3 }
 0x24a   : > { %p1045_p10 = pnand %p1044_p8, %p1038_p1 }
 0x297   : > { %v760_v20 = vpop.permute.xlu1 %759 }
 0x299   : > { %v762_v24 = vpop.permute.xlu0 %761 }
 0x29a   : > { %v763_v26 = vsel %vm569_vm0, %v760_v20, %v762_v24  ;;  %v764_v29 = vsel %vm569_vm0, %v762_v24, %v760_v20  ;;  %v777_v20 = vld [vmem:[%s1602_s8] sm:$0xf] }
 0x29b   : > { %v765_v30 = vmul.f32 %v763_v26, %v1338_v27  ;;  %v744_v33 = vpop.permute.xlu1 %743  ;;  %v766_v34 = vmul.f32 %v764_v29, %v1341_v28 }
 0x29d   : > { %v746_v35 = vpop.permute.xlu0 %745  ;;  %v776_v36 = vpack.c.bf16 %v766_v34, %v766_v34  ;;  %v775_v37 = vpack.c.bf16 %v765_v30, %v765_v30 }
 0x29e   : > { %v747_v44 = vsel %vm525_vm4, %v744_v33, %v746_v35  ;;  %v748_v45 = vsel %vm525_vm4, %v746_v35, %v744_v33 }
 0x29f   : > { %940 = vmatprep.subr.msk.bf16.mxu1 %vm611_vm5, %v776_v36  ;;  %v752_v40 = vpop.permute.xlu1 %751  ;;  %v789_v41 = vsel %vm611_vm5, %v775_v37, 0  ;;  %v749_v49 = vmul.f32 %v747_v44, %v1386_v57  ;;  %v750_v50 = vmul.f32 %v748_v45, %v1389_v58 }
 0x2a0   : > { %801 = vmatpush1.bf16.msra.mxu1 %v789_v41 }
 0x2a1   : > { %v754_v48 = vpop.permute.xlu0 %753 }
 0x2a2   : > { %v755_v27 = vsel %vm547_vm3, %v752_v40, %v754_v48  ;;  %v756_v28 = vsel %vm547_vm3, %v754_v48, %v752_v40 }
 0x2a3   : > { %v757_v51 = vmul.f32 %v755_v27, %v1368_v46  ;;  %v758_v52 = vmul.f32 %v756_v28, %v1371_v47  ;;  %v736_v53 = vpop.permute.xlu1 %735 }
 0x2a5   : > { %v738_v54 = vpop.permute.xlu0 %737  ;;  %v774_v22 = vpack.c.bf16 %v758_v52, %v750_v50  ;;  %v773_v55 = vpack.c.bf16 %v757_v51, %v749_v49 }
 0x2a6   : > { %v739_v23 = vsel %vm503_vm1, %v736_v53, %v738_v54  ;;  %v740_v56 = vsel %vm503_vm1, %v738_v54, %v736_v53 }
 0x2a7   : > { %v741_v59 = vmul.f32 %v739_v23, %v1357_v38  ;;  %v742_v57 = vmul.f32 %v740_v56, %v1360_v39  ;;  %802 = vmatprep.subr.bf16.mxu1 %v774_v22  ;;  %v720_v58 = vpop.permute.xlu1 %719 }
 0x2a8   : > { %803 = vmatpush1.bf16.msra.mxu1 %v773_v55 }
 0x2a9   : > { %v722_v46 = vpop.permute.xlu0 %721  ;;  %v772_v60 = vpack.c.bf16 %v742_v57, %v702_v18  ;;  %v771_v47 = vpack.c.bf16 %v741_v59, %v701_v14 }
 0x2aa   : > { %v723_v62 = vsel %vm459_vm9, %v720_v58, %v722_v46  ;;  %v724_v63 = vsel %vm459_vm9, %v722_v46, %v720_v58 }
 0x2ab   : > { %804 = vmatprep.subr.bf16.mxu1 %v772_v60  ;;  %v728_v61 = vpop.permute.xlu1 %727  ;;  %v725_v1 = vmul.f32 %v724_v63, %v1454_v42  ;;  %v726_v2 = vmul.f32 %v723_v62, %v1457_v43 }
 0x2ac   : > { %805 = vmatpush1.bf16.msra.mxu1 %v771_v47 }
 0x2ad   : > { %v730_v0 = vpop.permute.xlu0 %729 }
 0x2ae   : > { %v731_v38 = vsel %vm481_vm7, %v728_v61, %v730_v0  ;;  %v732_v39 = vsel %vm481_vm7, %v730_v0, %v728_v61 }
 0x2af   : > { %v733_v3 = vmul.f32 %v732_v39, %v1418_v17  ;;  %v734_v4 = vmul.f32 %v731_v38, %v1428_v25  ;;  %v704_v5 = vpop.permute.xlu1 %703 }
 0x2b1   : > { %v706_v6 = vpop.permute.xlu0 %705  ;;  %v770_v7 = vpack.c.bf16 %v734_v4, %v726_v2  ;;  %v769_v8 = vpack.c.bf16 %v733_v3, %v725_v1 }
 0x2b2   : > { %v707_v9 = vsel %vm416_vm8, %v704_v5, %v706_v6  ;;  %v708_v10 = vsel %vm416_vm8, %v706_v6, %v704_v5 }
 0x2b3   : > { %806 = vmatprep.subr.bf16.mxu1 %v770_v7  ;;  %v712_v42 = vpop.permute.xlu1 %711  ;;  %v709_v43 = vmul.f32 %v708_v10, %v1439_v31  ;;  %v710_v12 = vmul.f32 %v707_v9, %v1442_v32 }
 0x2b4   : > { %807 = vmatpush1.bf16.msra.mxu1 %v769_v8 }
 0x2b5   : > { %v714_v11 = vpop.permute.xlu0 %713 }
 0x2b6   : > { %v715_v17 = vsel %vm437_vm6, %v712_v42, %v714_v11  ;;  %v716_v25 = vsel %vm437_vm6, %v714_v11, %v712_v42 }
 0x2b7   : > { %v717_v13 = vmul.f32 %v716_v25, %v1412_v15  ;;  %v718_v14 = vmul.f32 %v715_v17, %v1415_v16 }
 0x2b9   : > { %v768_v18 = vpack.c.bf16 %v718_v14, %v710_v12  ;;  %v767_v19 = vpack.c.bf16 %v717_v13, %v709_v43 }
 0x2bb   : > { %808 = vmatprep.subr.bf16.mxu1 %v768_v18 }
 0x2bc   : > { %809 = vmatpush1.bf16.msra.mxu1 %v767_v19 }
 0x2bf   : > { %941 = vmatmul.mubr.msk.bf16.vlgmr.msra.gmra.mxu1 %vm784_vm11, %v777_v20 }
 0x2c0   : > { %v782_v21 = vpop.permute.xlu1 %781 }
 0x37f   : > { %v828_v31 = vpop.f32.mrf.mxu1 }
 0x380   : > { %v829_v15 = vadd.f32 %v828_v31, %v782_v21 }
 0x381   : > { %v830_v16 = vpop.f32.mrf.mxu1 }
 0x382   : > { %835 = vst [vmem:[%s375_s23] sm:$0xff] %v829_v15  ;;  %v831_v32 = vadd.f32 %v830_v16, %v782_v21 }
 0x383   : > { %v832_v24 = vpop.f32.mrf.mxu1 }
 0x384   : > { %836 = vst [vmem:[%s375_s23 + $0x8] sm:$0xff] %v831_v32 }
 0x385   : > { %v833_v26 = vpop.f32.mrf.mxu1 }
 0x386   : > { %1048 = shalt.err (!%p1045_p10)
}
 0x387   : > { %s1049_s24 = scalar_lea.hbm %s1551_s20, 256  ;;  %s1053_s19 = scalar_lea.hbm %s1604_s10, 512 }
 0x388   : > { %p1050_p2 = scmp.ne.s32.totalorder %s1551_s20, %s1049_s24  ;;  %p1054_p7 = scmp.lt.s32.totalorder %s1551_s20, %s1604_s10 }
 0x389   : > { %p1055_p0 = scmp.lt.s32.totalorder %s1053_s19, %s1049_s24 }
 0x38a   : > { %p1051_p4 = pnand %p1050_p2, %p1624_p12 }
 0x38b   : > { %p1056_p6 = por %p1055_p0, %p1054_p7 }
 0x38c   : > { %p1052_p9 = pneg %p1051_p4 }
 0x38e   : > { %p1057_p11 = pnand %p1056_p6, %p1052_p9 }
 0x390   : > { %1060 = shalt.err (!%p1057_p11)
}
 0x391   : > { %951 = dma.vmem_to_hbm [thread:$0]  (%p1624_p12), %s1553_s22, 256, %s1551_s20, %s838_s17  }
 0x392 PF: > { %s864_s18 = sand.u32 1, %s1087_s13   ;;  %p1625_p13 = scmp.ne.s32.totalorder %s1618_s26, 0 }
 0x393   : > { %p1626_p1 = scmp.ge.s32.totalorder %s1099_s16, 2  ;;  %s865_s12 = scalar_lea.sflag [#allocation4], %s864_s18 }
 0x395   : > { %p958_p3 = pnand %p1626_p1, %p1625_p13 }
 0x397   : > { %p959_p5 = pneg %p958_p3 }
 0x399   : > { %1082 = dma.done.wait (%p959_p5), %s865_s12, 256  }
 0x39a   : > { %1084 = vsyncadd (%p959_p5), %s865_s12, 4294967040  ;;  %s1627_s16 = sld [smem:[#allocation9_spill]]  ;;  %s1630_s13 = smov %s1091_s14 }
 0x39b   : > { %s1628_s21 = sld [smem:[#allocation8_spill]] }
 0x39c   : > { %s1629_s15 = sld [smem:[#allocation10_spill]] }
 0x3a0   : > { %p23_p8 = scmp.ge.s32.totalorder %s1627_s16, 4  }
 0x3a1   : > { %s1631_s14 = smov %s1628_s21 }
 0x3a2   :  { %25 = sbr.rel (!%p23_p8) target bundleno = 5 (0x5), region = 112 }
 0x3a7   :  { %870 = vsyncpa [#allocation3], 1 }
 0x3a8   :  { %872 = vsyncpa [#allocation3 + $0x1], 1 }
 0x3a9   :  { %873 = vsyncpa [#allocation4], 1 }
 0x3aa   :  { %875 = vsyncpa [#allocation4 + $0x1], 1 }

</bundles_post_ra>
